<compile_context>
chip_gen: v7x
topology: tpu7x:2x2x1
jax: 0.10.0
libtpu: 0.0.40
codegen_flags: <defaults>
</compile_context>

<pallas_src>
import math

import jax
import jax.numpy as jnp
from jax.experimental import pallas as pl
from jax.experimental.pallas import tpu as pltpu


def _cdiv(a: int, b: int) -> int:
    return -(-a // b)


def _round_up(a: int, b: int) -> int:
    return _cdiv(a, b) * b


def _num_embed_bcast_kernel(val_ref, w_ref, b_ref, out_ref):
    # val_ref: (TILE, 1); w_ref/b_ref: (1, D); out_ref: (TILE, D).
    # Implicit (TILE,1)*(1,D)+(1,D) broadcast -> VPU FMA, no materialized temps.
    out_ref[...] = val_ref[...] * w_ref[...] + b_ref[...]


def _num_embed_packed_kernel(val_ref, w_ref, b_ref, out_ref):
    # val_ref: (TILE, k); w_ref: (k, k*D) block-diagonal; b_ref: (1, k*D);
    # out_ref: (TILE, k*D).  out[r, j*D+d] = val[r, j] * W[d] + b[d].
    out_ref[...] = (
        jnp.dot(val_ref[...], w_ref[...], preferred_element_type=jnp.float32)
        + b_ref[...]
    )


def num_embed(value: jax.Array, weight: jax.Array, bias: jax.Array,
              *, target_tile_bytes: int = 2 << 20) -> jax.Array:
    """value: arbitrary shape; weight: (d_model, 1); bias: (d_model,)."""
    d_model = int(weight.shape[0])
    lead_shape = value.shape
    n = int(math.prod(lead_shape)) if lead_shape else 1

    val_flat = value.reshape(n).astype(jnp.float32)
    w_row = weight.reshape(1, d_model).astype(jnp.float32)
    b_row = bias.reshape(1, d_model).astype(jnp.float32)

    # Lane-packing factor: k*d_model is a multiple of 128 -> full-lane output stores.
    k = 128 // math.gcd(d_model, 128)
    kd = k * d_model

    if k == 1:
        w_in, b_in = w_row, b_row
        kernel = _num_embed_bcast_kernel
    else:
        # Block-diagonal weight: W_blk[j, j*D + d] = W[d, 0]; bias tiled k times.
        w_in = jnp.kron(jnp.eye(k, dtype=jnp.float32), w_row)   # (k, k*D)
        b_in = jnp.tile(b_row, (1, k))                          # (1, k*D)
        kernel = _num_embed_packed_kernel

    # Packed row count and row-tile size from the VMEM byte budget.
    m = _cdiv(n, k)
    tile_m = max(8, (target_tile_bytes // (kd * 4)) // 8 * 8)
    tile_m = min(tile_m, _round_up(m, 8))        # don't over-pad tiny inputs
    m_padded = _round_up(m, tile_m)
    n_padded = m_padded * k

    if n_padded != n:
        val_flat = jnp.pad(val_flat, (0, n_padded - n))
    val2d = val_flat.reshape(m_padded, k)

    grid = (m_padded // tile_m,)

    out = pl.pallas_call(
        kernel,
        out_shape=jax.ShapeDtypeStruct((m_padded, kd), jnp.float32),
        grid_spec=pltpu.PrefetchScalarGridSpec(
            num_scalar_prefetch=0,
            grid=grid,
            in_specs=[
                pl.BlockSpec((tile_m, k), lambda i: (i, 0)),
                pl.BlockSpec(w_in.shape, lambda i: (0, 0)),   # resident across steps
                pl.BlockSpec(b_in.shape, lambda i: (0, 0)),   # resident across steps
            ],
            out_specs=pl.BlockSpec((tile_m, kd), lambda i: (i, 0)),
        ),
        compiler_params=pltpu.CompilerParams(
            dimension_semantics=("parallel",),   # independent row tiles -> megacore on v7x
        ),
        cost_estimate=pl.CostEstimate(
            flops=2 * n * d_model,
            transcendentals=0,
            bytes_accessed=4 * (n + 2 * d_model + n * d_model),
        ),
    )(val2d, w_in, b_in)

    out = out.reshape(n_padded, d_model)
    if n_padded != n:
        out = out[:n]
    return out.reshape(*lead_shape, d_model)


if __name__ == "__main__":
    key = jax.random.PRNGKey(0)
    k_val, k_w, k_b = jax.random.split(key, 3)

    batch, seq, d_model = 2, 8, 32

    # nn.Linear(1, d_model): fan_in = 1 -> U(-1, 1) init for weight and bias.
    weight = jax.random.uniform(k_w, (d_model, 1), jnp.float32, -1.0, 1.0)
    bias = jax.random.uniform(k_b, (d_model,), jnp.float32, -1.0, 1.0)
    value = jax.random.normal(k_val, (batch, seq), jnp.float32)

    out = num_embed(value, weight, bias)
    jax.block_until_ready(out)
    ref = value[..., None] * weight[:, 0] + bias
    assert out.shape == (batch, seq, d_model)
    assert jnp.allclose(out, ref, atol=1e-5, rtol=1e-5)

    # Also exercise the lane-aligned (VPU broadcast-FMA) path: d_model multiple of 128.
    d2 = 128
    w2 = jax.random.uniform(k_w, (d2, 1), jnp.float32, -1.0, 1.0)
    b2 = jax.random.uniform(k_b, (d2,), jnp.float32, -1.0, 1.0)
    out2 = num_embed(value, w2, b2)
    jax.block_until_ready(out2)
    ref2 = value[..., None] * w2[:, 0] + b2
    assert out2.shape == (batch, seq, d2)
    assert jnp.allclose(out2, ref2, atol=1e-5, rtol=1e-5)

    print("KERNEL_OK")
</pallas_src>

<mosaic_0001>
module attributes {stable_mosaic.version = 11 : i64} {
  func.func @_num_embed_packed_kernel(%arg0: i32, %arg1: memref<8x4xf32, #tpu.memory_space<vmem>>, %arg2: memref<4x128xf32, #tpu.memory_space<vmem>>, %arg3: memref<1x128xf32, #tpu.memory_space<vmem>>, %arg4: memref<8x128xf32, #tpu.memory_space<vmem>>) attributes {dimension_semantics = [#tpu.dimension_semantics<parallel>], iteration_bounds = array<i64: 1>, scalar_prefetch = 0 : i64, scratch_operands = 0 : i64, tpu.core_type = #tpu.core_type<tc>, window_params = [{transform_indices = @transform_0, window_bounds = array<i64: 8, 4>}, {pipeline_mode = #tpu.pipeline_mode<synchronous>, transform_indices = @transform_1, window_bounds = array<i64: 4, 128>}, {pipeline_mode = #tpu.pipeline_mode<synchronous>, transform_indices = @transform_2, window_bounds = array<i64: 1, 128>}, {transform_indices = @transform_3, window_bounds = array<i64: 8, 128>}]} {
    %c0 = arith.constant 0 : index
    %c0_0 = arith.constant 0 : index
    %0 = vector.load %arg1[%c0, %c0_0] : memref<8x4xf32, #tpu.memory_space<vmem>>, vector<8x4xf32>
    %c0_1 = arith.constant 0 : index
    %c0_2 = arith.constant 0 : index
    %1 = vector.load %arg2[%c0_1, %c0_2] : memref<4x128xf32, #tpu.memory_space<vmem>>, vector<4x128xf32>
    %cst = arith.constant dense<0.000000e+00> : vector<8x128xf32>
    %2 = tpu.matmul %0, %1, %cst {dimension_numbers = #tpu.dot_dimension_numbers<[1], [0], [0], [1], [0, 0, 1, 1], [], []>} : vector<8x4xf32>, vector<4x128xf32>, vector<8x128xf32> -> vector<8x128xf32>
    %c0_3 = arith.constant 0 : index
    %c0_4 = arith.constant 0 : index
    %3 = vector.load %arg3[%c0_3, %c0_4] : memref<1x128xf32, #tpu.memory_space<vmem>>, vector<1x128xf32>
    %4 = vector.broadcast %3 : vector<1x128xf32> to vector<8x128xf32>
    %5 = arith.addf %2, %4 : vector<8x128xf32>
    %c0_5 = arith.constant 0 : index
    %c0_6 = arith.constant 0 : index
    %6 = vector.load %arg4[%c0_5, %c0_6] : memref<8x128xf32, #tpu.memory_space<vmem>>, vector<8x128xf32>
    tpu.vector_store %arg4[%c0_5, %c0_6], %5 {strides = array<i32>} : memref<8x128xf32, #tpu.memory_space<vmem>>, vector<8x128xf32>,
    return
  }
  func.func @transform_0(%arg0: i32) -> (i32, i32) {
    %c0_i32 = arith.constant 0 : i32
    %c0_i32_0 = arith.constant 0 : i32
    return %arg0, %c0_i32 : i32, i32
  }
  func.func @transform_1(%arg0: i32) -> (i32, i32) {
    %c0_i32 = arith.constant 0 : i32
    %c0_i32_0 = arith.constant 0 : i32
    %c0_i32_1 = arith.constant 0 : i32
    return %c0_i32, %c0_i32_0 : i32, i32
  }
  func.func @transform_2(%arg0: i32) -> (i32, i32) {
    %c0_i32 = arith.constant 0 : i32
    %c0_i32_0 = arith.constant 0 : i32
    %c0_i32_1 = arith.constant 0 : i32
    return %c0_i32, %c0_i32_0 : i32, i32
  }
  func.func @transform_3(%arg0: i32) -> (i32, i32) {
    %c0_i32 = arith.constant 0 : i32
    %c0_i32_0 = arith.constant 0 : i32
    return %arg0, %c0_i32 : i32, i32
  }
}

</mosaic_0001>

<bundles_post_ra>
// kernel: tpu_custom_call.1
= control target key start
LH: loop header
LB: loop body
LE: loop exit
PB: predicated region body
PF: predicated region fallthrough
CT: control target
= control target key end

     0   :  { %vm28_vm0 = vcmask 1043456   ;;  %v154_v2 = vmov 0.0   ;;  %vm155_vm1 = vmmov 0   ;;  %vm24_vm2 = vcmask 31744   ;;  %s198_s0 = inlined_call_operand.vmem [shape: f32[8,4], index: 0, kind: input, shape index: {}]   ;;  %s199_s1 = inlined_call_operand.vmem [shape: f32[4,128], index: 1, kind: input, shape index: {}]   ;;  %s200_s2 = inlined_call_operand.vmem [shape: f32[1,128], index: 2, kind: input, shape index: {}]   ;;  %s201_s3 = inlined_call_operand.hbm [shape: f32[8,128], index: 3, kind: output, shape index: {}]  }
   0x1   :  { %v16_v0 = vld [vmem:[%s199_s1] sm:$0xf]  ;;  %122 = vmatprep.subr.mxu0 %v154_v2  ;;  %124 = vmatprep.mubr.msk.f32.mxu0 %vm155_vm1, %v154_v2 }
   0x2   :  { %v15_v1 = vld [vmem:[%s198_s0] sm:$0xff] }
   0x3   :  { %8 = vsyncpa [#allocation3], 0  ;;  %123 = vmatpush3.msk.msra.mxu0 %vm28_vm0, %v16_v0  ;;  %v117_v3 = vld [vmem:[%s200_s2] ss:$0 sm:$0xff]  ;;  %s156_s18 = smov [#allocation2]  }
   0x4   :  { %125 = vmatmul.mubr.msk.f32.vlgmr.msra.gmra.mrb[0].mxu0 %vm24_vm2, %v15_v1  ;;  %s109_s19 = sshll.u32 %s156_s18, 4  ;;  %s110_s19 = int_to_ptr.vmem [resolvable:$true] %s109_s19 }
   0x5   :  { %s130_s0 = scalar_lea.vmem %s110_s19, 128  ;;  %p135_p1 = scmp.lt.s32.totalorder %s110_s19, %s110_s19 }
   0x6   :  { %p131_p0 = scmp.ne.s32.totalorder %s110_s19, %s130_s0  ;;  %p136_p2 = scmp.lt.s32.totalorder %s130_s0, %s130_s0 }
   0x8   :  { %p137_p3 = por %p136_p2, %p135_p1 }
   0xa   :  { %p138_p4 = pnand %p137_p3, %p131_p0 }
  0xd7   :  { %v98_v4 = vpop.f32.mrb[0].mxu0 }
  0xd8   :  { %v99_v5 = vadd.f32 %v117_v3, %v98_v4  ;;  %v126_v6 = vpop.f32.mrb[1].mxu0 }
  0xda   :  { %102 = vst [vmem:[#allocation2] sm:$0xff] %v99_v5 }
  0xdb   :  { %141 = shalt.err (!%p138_p4)
}
  0xdc   :  { %s142_s21 = scalar_lea.hbm %s201_s3, 128 }
  0xdd   :  { %p143_p5 = scmp.ne.s32.totalorder %s201_s3, %s142_s21  ;;  %p146_p6 = scmp.lt.u32.totalorder %s142_s21, %s201_s3 }
  0xdf   :  { %p148_p7 = pnand %p146_p6, %p143_p5 }
  0xe1   :  { %151 = shalt.err (!%p148_p7)
}
  0xe2   :  { %112 = dma.vmem_to_hbm [thread:$0]  %s110_s19, 128, %s201_s3, [#allocation3]  }
  0xe3   :  { %152 = dma.done.wait [#allocation3], 128  }
  0xe4   :  { %153 = vsyncadd [#allocation3], 4294967168 }
  0xe5   :  { %116 = vsyncpa [#allocation3], 1 }

</bundles_post_ra>
